<compile_context>
chip_gen: v5e
topology: v5e:2x2
jax: 0.10.0
libtpu: 0.0.40
codegen_flags: <defaults>
</compile_context>

<pallas_src>
import functools

import jax
import jax.numpy as jnp
from jax.experimental import pallas as pl
from jax.experimental.pallas import tpu as pltpu

_MIB = 1024 * 1024


def _vmem_capacity_bytes() -> int:
    """Physical VMEM per TensorCore; conservative default if the query fails."""
    try:
        info = pltpu.get_tpu_info()
        cap = int(getattr(info, "vmem_capacity_bytes", 0) or 0)
        if cap > 0:
            return cap
    except Exception:
        pass
    return 64 * _MIB  # v7x per-TC VMEM (smallest current generation)


def _make_row_kernel(Ls: int, L: int, out_dtype):
    """One grid step handles `bn` batch rows: [sil * p | pose] over all columns."""
    seam = min(((Ls + 127) // 128) * 128, L)  # first 128-aligned column at/after Ls
    split_pose = (seam != Ls) and (L - seam >= 128)

    def kernel(p_ref, sil_ref, pose_ref, out_ref):
        pv = p_ref[0].astype(out_dtype)  # scalar cast once; multiply in out dtype
        out_ref[:, :Ls] = sil_ref[...].astype(out_dtype) * pv
        pose = pose_ref[...].astype(out_dtype)
        if split_pose:
            # Misaligned seam: one masked store for the boundary sliver, then a
            # lane-aligned store for the bulk of the pose slab.
            out_ref[:, Ls:seam] = pose[:, : seam - Ls]
            out_ref[:, seam:] = pose[:, seam - Ls:]
        else:
            out_ref[:, Ls:] = pose

    return kernel


def _make_col_kernel(ns_chunks: int, out_dtype):
    """Column-tiled fallback: grid axis 1 walks sil column chunks, then pose chunks."""

    def kernel(p_ref, sil_ref, pose_ref, out_ref):
        j = pl.program_id(1)

        @pl.when(j < ns_chunks)
        def _():
            pv = p_ref[0].astype(out_dtype)
            out_ref[...] = sil_ref[...].astype(out_dtype) * pv

        @pl.when(j >= ns_chunks)
        def _():
            out_ref[...] = pose_ref[...].astype(out_dtype)

    return kernel


def _largest_aligned_divisor(Ls: int, cc_max: int) -> int:
    """Largest multiple of 128 that divides Ls and is <= cc_max (0 if none)."""
    if Ls % 128 != 0 or cc_max < 128:
        return 0
    k = min(cc_max // 128, Ls // 128)
    for kk in range(k, 0, -1):
        if Ls % (kk * 128) == 0:
            return kk * 128
    return 0


def cat_sil_pose(
    sil: jax.Array,
    pose: jax.Array,
    p: jax.Array,
    *,
    vmem_block_budget_bytes: int | None = None,
    vmem_limit_bytes: int | None = None,
) -> jax.Array:
    """out = concat([sil * p, pose], axis=1). NCHW inputs, p has one element."""
    N, Cs, H, W = sil.shape
    Np, Cp, Hp, Wp = pose.shape
    assert (N, H, W) == (Np, Hp, Wp), "sil/pose must match on N, H, W"

    p = jnp.asarray(p).reshape((1,))
    # Match PyTorch/jnp promotion for mixed-dtype inputs (e.g. bf16 sil * f32 p -> f32).
    out_dtype = jnp.promote_types(jnp.promote_types(sil.dtype, p.dtype), pose.dtype)

    Ls, Lp = Cs * H * W, Cp * H * W
    L = Ls + Lp

    # Free, layout-preserving reshapes (row-major NCHW).
    sil2 = sil.reshape(N, Ls)
    pose2 = pose.reshape(N, Lp)
    # f32 scalar in SMEM; cast to the compute dtype inside the kernel (lossless for
    # f32/bf16 parameters, so promotion semantics are unchanged).
    p32 = p.astype(jnp.float32)

    # ---- generation-aware VMEM sizing --------------------------------------
    cap = _vmem_capacity_bytes()
    if vmem_limit_bytes is None:
        vmem_limit_bytes = min(cap * 7 // 8, 100 * _MIB)  # ~56 MiB v7x, 100 MiB v5e/v6e
    if vmem_block_budget_bytes is None:
        vmem_block_budget_bytes = min(40 * _MIB, vmem_limit_bytes * 3 // 5)
    budget = min(int(vmem_block_budget_bytes), int(vmem_limit_bytes))

    sil_isz = jnp.dtype(sil.dtype).itemsize
    pose_isz = jnp.dtype(pose.dtype).itemsize
    out_isz = jnp.dtype(out_dtype).itemsize
    # Resident bytes per packed batch row (inputs + output, double-buffered).
    bytes_per_row = 2 * (Ls * sil_isz + Lp * pose_isz + L * out_isz)

    bn_fit = int(budget // bytes_per_row)
    min_rows = N if N < 8 else 8

    mk_params = functools.partial(
        pltpu.CompilerParams, vmem_limit_bytes=int(vmem_limit_bytes)
    )

    def _row_call(bn: int):
        grid = (pl.cdiv(N, bn),)
        return pl.pallas_call(
            _make_row_kernel(Ls, L, out_dtype),
            out_shape=jax.ShapeDtypeStruct((N, L), out_dtype),
            grid=grid,
            in_specs=[
                pl.BlockSpec(memory_space=pltpu.MemorySpace.SMEM),  # scalar p
                pl.BlockSpec((bn, Ls), lambda i: (i, 0)),
                pl.BlockSpec((bn, Lp), lambda i: (i, 0)),
            ],
            out_specs=pl.BlockSpec((bn, L), lambda i: (i, 0)),
            compiler_params=mk_params(dimension_semantics=("parallel",)),
        )(p32, sil2, pose2)

    if bn_fit >= min_rows:
        # ------------------------ row-tiled path (common) --------------------
        if bn_fit >= N:
            bn = N
            if N >= 16:
                # Guarantee >= 2 parallel grid steps so both v7x TensorCores
                # participate in this DMA-bound stream (neutral on v5e/v6e).
                bn = max(8, (((N + 1) // 2) // 8) * 8)
        else:
            bn = (bn_fit // 8) * 8  # floor only — never round up past the budget
        out2 = _row_call(bn)
    else:
        # -------------- column-tiled fallback (very large C*H*W) -------------
        bn = min_rows
        per_col = 2 * bn * (sil_isz + pose_isz + out_isz)
        cc = _largest_aligned_divisor(Ls, int(budget // per_col))
        if cc == 0:
            # TODO(synk): Ls not 128-aligned (or pathologically large rows); fall
            # back to one min(N,8)-row block per step under the raised vmem limit.
            out2 = _row_call(bn)
        else:
            ns = Ls // cc            # sil column chunks (exact: cc divides Ls)
            npc = pl.cdiv(Lp, cc)    # pose column chunks (last may be partial)
            grid = (pl.cdiv(N, bn), ns + npc)
            out2 = pl.pallas_call(
                _make_col_kernel(ns, out_dtype),
                out_shape=jax.ShapeDtypeStruct((N, L), out_dtype),
                grid=grid,
                in_specs=[
                    pl.BlockSpec(memory_space=pltpu.MemorySpace.SMEM),  # scalar p
                    # Clamped index maps: no redundant DMAs while the other half runs.
                    pl.BlockSpec((bn, cc), lambda i, j: (i, jnp.minimum(j, ns - 1))),
                    pl.BlockSpec((bn, cc), lambda i, j: (i, jnp.maximum(j - ns, 0))),
                ],
                out_specs=pl.BlockSpec((bn, cc), lambda i, j: (i, j)),
                compiler_params=mk_params(dimension_semantics=("parallel", "parallel")),
            )(p32, sil2, pose2)

    return out2.reshape(N, Cs + Cp, H, W)


if __name__ == "__main__":
    key = jax.random.PRNGKey(0)
    k1, k2, k3, k4, k5, k6 = jax.random.split(key, 6)

    checks = []

    # Parameter init matching nn.Parameter(torch.ones(1) * 5).
    p = jnp.ones((1,), dtype=jnp.float32) * 5.0

    # 1) Base case: small NCHW, all f32 (module defaults). Single-step row path.
    N, Cs, Cp, H, W = 2, 4, 2, 16, 16
    sil = jax.random.normal(k1, (N, Cs, H, W), dtype=jnp.float32)
    pose = jax.random.normal(k2, (N, Cp, H, W), dtype=jnp.float32)
    out = jax.block_until_ready(cat_sil_pose(sil, pose, p))
    ref = jnp.concatenate([sil * p[0], pose], axis=1)
    assert out.shape == (N, Cs + Cp, H, W) and out.dtype == jnp.float32
    checks.append(bool(jnp.allclose(out, ref, atol=1e-6, rtol=1e-6)))

    # 2) bf16 activations + f32 parameter (promotes to f32); N=16 exercises the
    #    >=2 parallel grid steps that feed both v7x TensorCores.
    N = 16
    sil = jax.random.normal(k3, (N, Cs, H, W), dtype=jnp.bfloat16)
    pose = jax.random.normal(k4, (N, Cp, H, W), dtype=jnp.bfloat16)
    out = jax.block_until_ready(cat_sil_pose(sil, pose, p))
    ref = jnp.concatenate(
        [sil.astype(jnp.float32) * p[0], pose.astype(jnp.float32)], axis=1
    )
    assert out.dtype == jnp.float32
    checks.append(bool(jnp.allclose(out, ref, atol=1e-6, rtol=1e-6)))

    # 3) Forced tiny budget -> exercises the column-tiled fallback path.
    sil = jax.random.normal(k5, (N, Cs, H, W), dtype=jnp.float32)
    pose = jax.random.normal(k6, (N, Cp, H, W), dtype=jnp.float32)
    out = jax.block_until_ready(
        cat_sil_pose(sil, pose, p, vmem_block_budget_bytes=100_000)
    )
    ref = jnp.concatenate([sil * p[0], pose], axis=1)
    checks.append(bool(jnp.allclose(out, ref, atol=1e-6, rtol=1e-6)))

    # 4) Cs*H*W not a multiple of 128 -> exercises the seam-split store path.
    N2, Cs2, Cp2, H2, W2 = 2, 3, 13, 5, 8
    sil = jax.random.normal(k1, (N2, Cs2, H2, W2), dtype=jnp.float32)
    pose = jax.random.normal(k2, (N2, Cp2, H2, W2), dtype=jnp.float32)
    out = jax.block_until_ready(cat_sil_pose(sil, pose, p))
    ref = jnp.concatenate([sil * p[0], pose], axis=1)
    checks.append(bool(jnp.allclose(out, ref, atol=1e-6, rtol=1e-6)))

    assert all(checks), f"mismatch in checks: {checks}"
    print("KERNEL_OK")
</pallas_src>

<mosaic_0001>
module attributes {stable_mosaic.version = 11 : i64} {
  func.func @kernel(%arg0: i32, %arg1: memref<1xf32, #tpu.memory_space<smem>>, %arg2: memref<2x1024xf32, #tpu.memory_space<vmem>>, %arg3: memref<2x512xf32, #tpu.memory_space<vmem>>, %arg4: memref<2x1536xf32, #tpu.memory_space<vmem>>) attributes {dimension_semantics = [#tpu.dimension_semantics<parallel>], iteration_bounds = array<i64: 1>, scalar_prefetch = 0 : i64, scratch_operands = 0 : i64, tpu.core_type = #tpu.core_type<tc>, window_params = [{transform_indices = @transform_0, window_bounds = array<i64: 1>}, {transform_indices = @transform_1, window_bounds = array<i64: 2, 1024>}, {transform_indices = @transform_2, window_bounds = array<i64: 2, 512>}, {transform_indices = @transform_3, window_bounds = array<i64: 2, 1536>}]} {
    %c0 = arith.constant 0 : index
    %0 = memref.load %arg1[%c0] : memref<1xf32, #tpu.memory_space<smem>>
    %c0_0 = arith.constant 0 : index
    %c0_1 = arith.constant 0 : index
    %1 = vector.load %arg2[%c0_0, %c0_1] : memref<2x1024xf32, #tpu.memory_space<vmem>>, vector<2x1024xf32>
    %2 = vector.broadcast %0 : f32 to vector<2x1024xf32>
    %3 = arith.mulf %1, %2 : vector<2x1024xf32>
    %c0_2 = arith.constant 0 : index
    %c0_3 = arith.constant 0 : index
    %4 = vector.load %arg4[%c0_2, %c0_3] : memref<2x1536xf32, #tpu.memory_space<vmem>>, vector<2x1024xf32>
    tpu.vector_store %arg4[%c0_2, %c0_3], %3 {strides = array<i32>} : memref<2x1536xf32, #tpu.memory_space<vmem>>, vector<2x1024xf32>,
    %c0_4 = arith.constant 0 : index
    %c0_5 = arith.constant 0 : index
    %5 = vector.load %arg3[%c0_4, %c0_5] : memref<2x512xf32, #tpu.memory_space<vmem>>, vector<2x512xf32>
    %c0_6 = arith.constant 0 : index
    %c1024 = arith.constant 1024 : index
    %6 = vector.load %arg4[%c0_6, %c1024] : memref<2x1536xf32, #tpu.memory_space<vmem>>, vector<2x512xf32>
    tpu.vector_store %arg4[%c0_6, %c1024], %5 {strides = array<i32>} : memref<2x1536xf32, #tpu.memory_space<vmem>>, vector<2x512xf32>,
    return
  }
  func.func @transform_0(%arg0: i32) -> i32 {
    %c0_i32 = arith.constant 0 : i32
    %c0_i32_0 = arith.constant 0 : i32
    return %c0_i32 : i32
  }
  func.func @transform_1(%arg0: i32) -> (i32, i32) {
    %c0_i32 = arith.constant 0 : i32
    %c0_i32_0 = arith.constant 0 : i32
    return %arg0, %c0_i32 : i32, i32
  }
  func.func @transform_2(%arg0: i32) -> (i32, i32) {
    %c0_i32 = arith.constant 0 : i32
    %c0_i32_0 = arith.constant 0 : i32
    return %arg0, %c0_i32 : i32, i32
  }
  func.func @transform_3(%arg0: i32) -> (i32, i32) {
    %c0_i32 = arith.constant 0 : i32
    %c0_i32_0 = arith.constant 0 : i32
    return %arg0, %c0_i32 : i32, i32
  }
}

</mosaic_0001>

<bundles_post_ra>
// kernel: tpu_custom_call.1
= control target key start
LH: loop header
LB: loop body
LE: loop exit
PB: predicated region body
PF: predicated region fallthrough
CT: control target
= control target key end

     0   :  { %9 = vsyncpa [#allocation4], 0  ;;  %s188_s0 = inlined_call_operand.<no memory space> [shape: f32[1], index: 0, kind: input, shape index: {}]   ;;  %s189_s1 = inlined_call_operand.hbm [shape: f32[2,1024], index: 1, kind: input, shape index: {}]   ;;  %s190_s2 = inlined_call_operand.hbm [shape: f32[2,512], index: 2, kind: input, shape index: {}]   ;;  %s191_s3 = inlined_call_operand.hbm [shape: f32[2,1536], index: 3, kind: output, shape index: {}]  }
   0x1   :  { %10 = vsyncpa [#allocation7], 0 }
   0x2   :  { %11 = vsyncpa [#allocation5], 0  ;;  %s19_s14 = sshll.u32 %s189_s1, 4  ;;  %s153_s15 = smov [#allocation3]   ;;  %s20_s14 = int_to_ptr.hbm [resolvable:$true] %s19_s14 }
   0x3   :  { %s21_s16 = sshll.u32 %s153_s15, 4  ;;  %s30_s19 = sshll.u32 %s190_s2, 4  ;;  %s22_s16 = int_to_ptr.vmem [resolvable:$true] %s21_s16  ;;  %s31_s19 = int_to_ptr.hbm [resolvable:$true] %s30_s19 }
   0x4   :  { %24 = dma.hbm_to_vmem [thread:$0]  %s20_s14, 256, %s22_s16, [#allocation4]  }
   0x5   :  { %s154_s20 = smov [#allocation6]  }
   0x6   :  { %s32_s21 = sshll.u32 %s154_s20, 4  ;;  %s33_s21 = int_to_ptr.vmem [resolvable:$true] %s32_s21 }
   0x7   :  { %35 = dma.hbm_to_vmem [thread:$0]  %s31_s19, 128, %s33_s21, [#allocation7]  }
   0x8   :  { %147 = dma.done.wait [#allocation4], 256  }
   0x9   :  { %148 = vsyncadd [#allocation4], 4294967040 }
   0xa   :  { %149 = dma.done.wait [#allocation7], 128  }
   0xb   :  { %150 = vsyncadd [#allocation7], 4294967168  ;;  %v47_v0 = vstv %s188_s0  ;;  %s155_s23 = smov [#allocation8]   ;;  %s61_s2 = sshll.u32 %s191_s3, 4  ;;  %v45_v1 = vld [vmem:[#allocation3] sm:$0xff]  ;;  %v46_v2 = vld [vmem:[#allocation3 + $0x8] sm:$0xff]  ;;  %s62_s2 = int_to_ptr.hbm [resolvable:$true] %s61_s2 }
   0xc   :  { %s59_s24 = sshll.u32 %s155_s23, 4  ;;  %v52_v3 = vld [vmem:[#allocation6] sm:$0xff]  ;;  %v48_v4 = vmul.f32 %v47_v0, %v45_v1  ;;  %v49_v5 = vmul.f32 %v47_v0, %v46_v2  ;;  %s60_s24 = int_to_ptr.vmem [resolvable:$true] %s59_s24 }
   0xd   :  { %53 = vst [vmem:[#allocation8 + $0x10] sm:$0xff] %v52_v3 }
   0xe   :  { %50 = vst [vmem:[#allocation8] sm:$0xff] %v48_v4 }
   0xf   :  { %51 = vst [vmem:[#allocation8 + $0x8] sm:$0xff] %v49_v5 }
  0x10   :  { %64 = dma.vmem_to_hbm [thread:$0]  %s60_s24, 384, %s62_s2, [#allocation5]  }
  0x11   :  { %151 = dma.done.wait [#allocation5], 384  }
  0x12   :  { %152 = vsyncadd [#allocation5], 4294966912 }
  0x13   :  { %69 = vsyncpa [#allocation4], 1 }
  0x14   :  { %70 = vsyncpa [#allocation7], 1 }
  0x15   :  { %71 = vsyncpa [#allocation5], 1 }

</bundles_post_ra>
